<compile_context>
chip_gen: v7x
topology: tpu7x:2x2x1
jax: 0.10.0
libtpu: 0.0.40
codegen_flags: <defaults>
</compile_context>

<pallas_src>
import functools

import jax
import jax.numpy as jnp
from jax.experimental import pallas as pl
from jax.experimental.pallas import tpu as pltpu


def gem_kernel(p_ref, x_ref, o_ref, *, eps, inv_hw):
    # p is the learned scalar parameter, held in SMEM.
    p = p_ref[0]
    x = x_ref[...]

    # Element-wise math in bf16 when the input is bf16 (v6e/v7x bf16 EUP);
    # otherwise f32 (v5e has no bf16 VPU/EUP, so f32 inputs stay f32).
    cdt = jnp.bfloat16 if x.dtype == jnp.bfloat16 else jnp.float32

    xc = jnp.maximum(x.astype(cdt), jnp.asarray(eps, cdt))
    # clamp(min=eps) guarantees xc > 0, so pow(xc, p) == exp(p * log(xc)).
    xp = jnp.exp(p.astype(cdt) * jnp.log(xc))

    # Accumulate the spatial mean in f32 regardless of compute dtype.
    s = jnp.sum(xp.astype(jnp.float32), axis=-1)         # (TILE_NC,)
    m = s * jnp.float32(inv_hw)                           # mean over H*W, > 0

    # Final pow(1/p) in f32; m > 0 so exp/log form matches pow exactly.
    y = jnp.exp((jnp.float32(1.0) / p) * jnp.log(m))      # (TILE_NC,)

    # Lane-dense store: (TILE_NC,) -> (1, TILE_NC) output row.
    o_ref[...] = y.reshape(1, -1).astype(o_ref.dtype)


def _pick_tile_nc(nc, hw, itemsize):
    # Target ~4 MiB per input tile (~8 MiB double-buffered): comfortably inside
    # the v7x 64 MiB VMEM (32 MiB scoped) while big enough to sit near the HBM
    # roofline on v5e/v6e.
    target_bytes = 4 * 1024 * 1024
    t = (target_bytes // max(1, hw * itemsize)) // 128 * 128
    t = max(t, 128)           # lane-dense output block needs a multiple of 128
    return nc if t >= nc else t


def gem_forward(x, p, eps=1e-6):
    """x: (N, C, H, W); p: scalar array shape (1,). Returns (N, C, 1, 1)."""
    N, C, H, W = x.shape
    NC, HW = N * C, H * W
    x2d = x.reshape(NC, HW)
    p_arr = jnp.asarray(p, dtype=jnp.float32).reshape(1)

    tile_nc = _pick_tile_nc(NC, HW, x2d.dtype.itemsize)
    grid = (pl.cdiv(NC, tile_nc),)

    cost = pl.CostEstimate(
        flops=3 * NC * HW,
        transcendentals=2 * NC * HW + 2 * NC,
        bytes_accessed=NC * HW * x2d.dtype.itemsize + NC * x2d.dtype.itemsize,
    )

    out2d = pl.pallas_call(
        functools.partial(gem_kernel, eps=float(eps), inv_hw=1.0 / float(HW)),
        out_shape=jax.ShapeDtypeStruct((1, NC), x.dtype),
        grid=grid,
        in_specs=[
            pl.BlockSpec(memory_space=pltpu.SMEM),            # p (scalar param)
            pl.BlockSpec((tile_nc, HW), lambda i: (i, 0)),    # input row-tile
        ],
        out_specs=pl.BlockSpec((1, tile_nc), lambda i: (0, i)),  # lane-dense out
        compiler_params=pltpu.CompilerParams(
            dimension_semantics=("parallel",),
            vmem_limit_bytes=32 * 1024 * 1024,
        ),
        cost_estimate=cost,
    )(p_arr, x2d)

    return out2d.reshape(N, C, 1, 1)


if __name__ == "__main__":
    key = jax.random.PRNGKey(0)
    N, C, H, W = 2, 4, 16, 16
    x = jax.random.normal(key, (N, C, H, W), dtype=jnp.float32)

    # Deterministic parameter init, matching nn module __init__: p = ones(1) * 3
    p = jnp.ones((1,), dtype=jnp.float32) * 3.0
    eps = 1e-6

    y = gem_forward(x, p, eps)
    y = jax.block_until_ready(y)

    # Reference check in plain JAX (same math as F.avg_pool2d over full spatial).
    ref = jnp.power(
        jnp.mean(jnp.power(jnp.maximum(x, eps), p[0]), axis=(2, 3), keepdims=True),
        1.0 / p[0],
    )
    assert y.shape == (N, C, 1, 1)
    assert jnp.allclose(y, ref, rtol=1e-5, atol=1e-5)

    print("KERNEL_OK")
</pallas_src>

<mosaic_0001>
module attributes {stable_mosaic.version = 11 : i64} {
  func.func @gem_kernel(%arg0: i32, %arg1: memref<1xf32, #tpu.memory_space<smem>>, %arg2: memref<8x256xf32, #tpu.memory_space<vmem>>, %arg3: memref<1x8xf32, #tpu.memory_space<vmem>>) attributes {dimension_semantics = [#tpu.dimension_semantics<parallel>], iteration_bounds = array<i64: 1>, scalar_prefetch = 0 : i64, scratch_operands = 0 : i64, tpu.core_type = #tpu.core_type<tc>, window_params = [{transform_indices = @transform_0, window_bounds = array<i64: 1>}, {transform_indices = @transform_1, window_bounds = array<i64: 8, 256>}, {transform_indices = @transform_2, window_bounds = array<i64: 1, 8>}]} {
    %c0 = arith.constant 0 : index
    %0 = memref.load %arg1[%c0] : memref<1xf32, #tpu.memory_space<smem>>
    %c0_0 = arith.constant 0 : index
    %c0_1 = arith.constant 0 : index
    %1 = vector.load %arg2[%c0_0, %c0_1] : memref<8x256xf32, #tpu.memory_space<vmem>>, vector<8x256xf32>
    %cst = arith.constant 9.99999997E-7 : f32
    %2 = vector.broadcast %cst : f32 to vector<8x256xf32>
    %3 = arith.maximumf %1, %2 : vector<8x256xf32>
    %4 = math.log %3 : vector<8x256xf32>
    %5 = vector.broadcast %0 : f32 to vector<8x256xf32>
    %6 = arith.mulf %5, %4 : vector<8x256xf32>
    %7 = math.exp %6 : vector<8x256xf32>
    %cst_2 = arith.constant dense<0.000000e+00> : vector<8xf32>
    %8 = vector.multi_reduction <add>, %7, %cst_2 [1] : vector<8x256xf32> to vector<8xf32>
    %cst_3 = arith.constant 3.906250e-03 : f32
    %9 = vector.broadcast %cst_3 : f32 to vector<8xf32>
    %10 = arith.mulf %8, %9 : vector<8xf32>
    %cst_4 = arith.constant 1.000000e+00 : f32
    %11 = arith.divf %cst_4, %0 : f32
    %12 = math.log %10 : vector<8xf32>
    %13 = vector.broadcast %11 : f32 to vector<8xf32>
    %14 = arith.mulf %13, %12 : vector<8xf32>
    %15 = math.exp %14 : vector<8xf32>
    %16 = vector.shape_cast %15 : vector<8xf32> to vector<1x8xf32>
    %c0_5 = arith.constant 0 : index
    %c0_6 = arith.constant 0 : index
    %17 = vector.load %arg3[%c0_5, %c0_6] : memref<1x8xf32, #tpu.memory_space<vmem>>, vector<1x8xf32>
    tpu.vector_store %arg3[%c0_5, %c0_6], %16 {strides = array<i32>} : memref<1x8xf32, #tpu.memory_space<vmem>>, vector<1x8xf32>,
    return
  }
  func.func @transform_0(%arg0: i32) -> i32 {
    %c0_i32 = arith.constant 0 : i32
    %c0_i32_0 = arith.constant 0 : i32
    return %c0_i32 : i32
  }
  func.func @transform_1(%arg0: i32) -> (i32, i32) {
    %c0_i32 = arith.constant 0 : i32
    %c0_i32_0 = arith.constant 0 : i32
    return %arg0, %c0_i32 : i32, i32
  }
  func.func @transform_2(%arg0: i32) -> (i32, i32) {
    %c0_i32 = arith.constant 0 : i32
    %c0_i32_0 = arith.constant 0 : i32
    return %c0_i32, %arg0 : i32, i32
  }
}

</mosaic_0001>

<bundles_post_ra>
// kernel: tpu_custom_call.1
= control target key start
LH: loop header
LB: loop body
LE: loop exit
PB: predicated region body
PF: predicated region fallthrough
CT: control target
= control target key end

     0   :  { %8 = vsyncpa [#allocation4], 0  ;;  %s189_s0 = inlined_call_operand.<no memory space> [shape: f32[1], index: 0, kind: input, shape index: {}]   ;;  %s190_s1 = inlined_call_operand.hbm [shape: f32[8,256], index: 1, kind: input, shape index: {}]   ;;  %s191_s2 = inlined_call_operand.hbm [shape: f32[1,8], index: 2, kind: output, shape index: {}]  }
   0x1   :  { %9 = vsyncpa [#allocation5], 0  ;;  %s145_s9 = smov [#allocation3]   ;;  %s97_s13 = scalar_lea.hbm %s190_s1, 256 }
   0x2   :  { %s18_s10 = sshll.u32 %s145_s9, 4  ;;  %p98_p0 = scmp.ne.s32.totalorder %s190_s1, %s97_s13  ;;  %s19_s10 = int_to_ptr.vmem [resolvable:$true] %s18_s10 }
   0x3   :  { %p101_p1 = scmp.lt.u32.totalorder %s97_s13, %s190_s1 }
   0x5   :  { %p103_p2 = pnand %p101_p1, %p98_p0 }
   0x7   :  { %106 = shalt.err (!%p103_p2)
}
   0x8   :  { %s107_s18 = scalar_lea.vmem %s19_s10, 256  ;;  %p112_p4 = scmp.lt.s32.totalorder %s19_s10, %s19_s10 }
   0x9   :  { %p108_p3 = scmp.ne.s32.totalorder %s19_s10, %s107_s18  ;;  %p113_p5 = scmp.lt.s32.totalorder %s107_s18, %s107_s18 }
   0xb   :  { %p114_p6 = por %p113_p5, %p112_p4 }
   0xd   :  { %p115_p7 = pnand %p114_p6, %p108_p3 }
   0xf   :  { %118 = shalt.err (!%p115_p7)
}
  0x10   :  { %21 = dma.hbm_to_vmem [thread:$0]  %s190_s1, 256, %s19_s10, [#allocation4]  }
  0x11   :  { %141 = dma.done.wait [#allocation4], 256  }
  0x12   :  { %142 = vsyncadd [#allocation4], 4294967040  ;;  %v34_v0 = vstv %s189_s0  ;;  %v26_v1 = vld [vmem:[#allocation3] sm:$0xff]  ;;  %v27_v2 = vld [vmem:[#allocation3 + $0x8] sm:$0xff]  ;;  %v55_v24 = vlaneseq  ;;  %s146_s1 = smov [#allocation6]   ;;  %vm62_vm0 = vcmask 57344  }
  0x13   :  { %83 = vrcp.f32 %v34_v0  ;;  %v28_v3 = vmax.f32 %v26_v1, 1e-06  ;;  %v29_v4 = vmax.f32 %v27_v2, 1e-06  ;;  %s70_s23 = sshll.u32 %s146_s1, 4  ;;  %s71_s23 = int_to_ptr.vmem [resolvable:$true] %s70_s23 }
  0x14   :  { %v56_v25 = vand.u32 127, %v55_v24  ;;  %v58_v26 = vshrl.u32 %v55_v24, 7  ;;  %s119_s24 = scalar_lea.vmem %s71_s23, 16  ;;  %s123_s25 = scalar_lea.vmem %s71_s23, 32 }
  0x15   :  { %85 = vlog2.f32 %v28_v3  ;;  %p120_p8 = scmp.ne.s32.totalorder %s71_s23, %s119_s24  ;;  %p124_p9 = scmp.lt.s32.totalorder %s71_s23, %s71_s23 }
  0x16   :  { %87 = vlog2.f32 %v29_v4  ;;  %v59_v27 = vsub.s32 %v56_v25, %v58_v26  ;;  %p125_p10 = scmp.lt.s32.totalorder %s123_s25, %s119_s24 }
  0x18   :  { %p126_p11 = por %p125_p10, %p124_p9 }
  0x1a   :  { %p127_p12 = pnand %p126_p11, %p120_p8 }
  0x1d   :  { %v84_v5 = vpop.eup %83 }
  0x1e   :  { %79 = vpush %v84_v5 }
  0x1f   :  { %v86_v6 = vpop.eup %85 }
  0x20   :  { %v88_v7 = vpop.eup %87  ;;  %v31_v8 = vmul.f32 0.6931472, %v86_v6 }
  0x21   :  { %v33_v9 = vmul.f32 0.6931472, %v88_v7 }
  0x22   :  { %v35_v10 = vmul.f32 %v34_v0, %v31_v8 }
  0x23   :  { %v36_v11 = vmul.f32 %v34_v0, %v33_v9 }
  0x24   :  { %v37_v12 = vmul.f32 1.442695, %v35_v10 }
  0x25   :  { %v39_v13 = vmul.f32 1.442695, %v36_v11 }
  0x26   :  { %89 = vpow2.f32 %v37_v12 }
  0x27   :  { %91 = vpow2.f32 %v39_v13 }
  0x30   :  { %v90_v14 = vpop.eup %89 }
  0x31   :  { %v92_v15 = vpop.eup %91 }
  0x32   :  { %v41_v16 = vadd.f32 %v92_v15, %v90_v14 }
  0x34   :  { %42 = vadd.xlane.f32.xlu0 %v41_v16 }
  0x4f   :  { %s80_s0 = spop %79 }
  0x50   :  { %v50_v20 = vstv %s80_s0 }
  0xc1   :  { %v43_v17 = vpop.xlane.xlu0 %42 }
  0xc2   :  { %v44_v18 = vmul.f32 0.00390625, %v43_v17 }
  0xc4   :  { %93 = vlog2.f32 %v44_v18 }
  0xce   :  { %v94_v19 = vpop.eup %93 }
  0xcf   :  { %v49_v21 = vmul.f32 0.6931472, %v94_v19 }
  0xd1   :  { %v51_v22 = vmul.f32 %v50_v20, %v49_v21 }
  0xd3   :  { %v52_v23 = vmul.f32 1.442695, %v51_v22 }
  0xd5   :  { %95 = vpow2.f32 %v52_v23 }
  0xdf   :  { %v96_v28 = vpop.eup %95 }
  0xe0   :  { %v60_v29 = vrot.slane %v96_v28, %v59_v27 }
  0xe2   :  { %63 = vst.msk [vmem:[#allocation6] sm:$0x1] %vm62_vm0, %v60_v29 }
  0xe3   :  { %130 = shalt.err (!%p127_p12)
}
  0xe4   :  { %s131_s28 = scalar_lea.hbm %s191_s2, 16 }
  0xe5   :  { %p132_p13 = scmp.ne.s32.totalorder %s191_s2, %s131_s28  ;;  %p135_p0 = scmp.lt.u32.totalorder %s131_s28, %s191_s2 }
  0xe7   :  { %p137_p1 = pnand %p135_p0, %p132_p13 }
  0xe9   :  { %140 = shalt.err (!%p137_p1)
}
  0xea   :  { %73 = dma.vmem_to_hbm [thread:$0]  %s71_s23, 16, %s191_s2, [#allocation5]  }
  0xeb   :  { %143 = dma.done.wait [#allocation5], 16  }
  0xec   :  { %144 = vsyncadd [#allocation5], 4294967280 }
  0xed   :  { %77 = vsyncpa [#allocation4], 1 }
  0xee   :  { %78 = vsyncpa [#allocation5], 1 }

</bundles_post_ra>
